<compile_context>
chip_gen: v7x
topology: tpu7x:2x2x1
jax: 0.10.0
libtpu: 0.0.40
codegen_flags: <defaults>
</compile_context>

<pallas_src>
import functools

import jax
import jax.numpy as jnp
from jax.experimental import pallas as pl
from jax.experimental.pallas import tpu as pltpu


def _ssm_kernel(x_ref, w0_ref, b0_ref, wdil_ref, bdil_ref, w11_ref, b11_ref,
                o_ref, pad_ref, stack_ref, *, num_layers, d_max, T, F):
    """One grid step = (batch element n, layer l).

    pad_ref  : VMEM (F, T + 2*d_max) -- residual feature map, zero halo of d_max columns.
    stack_ref: VMEM (3F, T)          -- [x[t-d]; x[t]; x[t+d]] for the fused dilated conv.
    """
    l = pl.program_id(1)
    prec = jax.lax.Precision.HIGHEST

    # ---- layer 0: initial 1x1 conv, zero the halo ----
    @pl.when(l == 0)
    def _init():
        pad_ref[...] = jnp.zeros_like(pad_ref)
        feat0 = jnp.dot(w0_ref[...], x_ref[0],
                        preferred_element_type=jnp.float32,
                        precision=prec) + b0_ref[...]
        pad_ref[:, d_max:d_max + T] = feat0

    center = pad_ref[:, d_max:d_max + T]            # (F, T) current features
    stack_ref[F:2 * F, :] = center                  # k = 1 tap (x[t])

    # Select the +/- d shifted taps with static slices (d = 2**l), guarded by pl.when.
    def _select_taps(i):
        d = 2 ** i

        @pl.when(l == i)
        def _():
            stack_ref[0:F, :] = pad_ref[:, d_max - d:d_max - d + T]        # x[t - d]
            stack_ref[2 * F:3 * F, :] = pad_ref[:, d_max + d:d_max + d + T]  # x[t + d]

    for i in range(num_layers):
        _select_taps(i)

    # Fused dilated conv (one K=3F matmul) -> ReLU -> 1x1 conv -> residual add.
    h = jnp.dot(wdil_ref[0], stack_ref[...],
                preferred_element_type=jnp.float32, precision=prec) + bdil_ref[0]
    h = jnp.maximum(h, 0.0)
    h = jnp.dot(w11_ref[0], h,
                preferred_element_type=jnp.float32, precision=prec) + b11_ref[0]
    # dropout -> identity (inference)
    pad_ref[:, d_max:d_max + T] = center + h

    @pl.when(l == num_layers - 1)
    def _write():
        o_ref[0] = pad_ref[:, d_max:d_max + T].astype(o_ref.dtype)


def single_stage_model_pallas(x_nct, params, num_layers):
    """x_nct: (N, dim_in, T) float32 (PyTorch NCW layout). Returns (N, F, T)."""
    w0, b0, wdil, bdil, w11, b11 = params
    N, Cin, T = x_nct.shape
    F = w0.shape[0]
    L = num_layers
    D = 2 ** (L - 1)                                 # max dilation -> halo width

    kernel = functools.partial(_ssm_kernel, num_layers=L, d_max=D, T=T, F=F)

    flops = 2 * N * T * (Cin * F + L * (3 * F * F + F * F))
    bytes_accessed = 4 * (x_nct.size + N * F * T + w0.size + b0.size
                          + wdil.size + bdil.size + w11.size + b11.size)

    out = pl.pallas_call(
        kernel,
        out_shape=jax.ShapeDtypeStruct((N, F, T), jnp.float32),
        grid_spec=pltpu.PrefetchScalarGridSpec(
            num_scalar_prefetch=0,
            grid=(N, L),
            in_specs=[
                pl.BlockSpec((1, Cin, T), lambda n, l: (n, 0, 0)),     # x (resident per n)
                pl.BlockSpec((F, Cin), lambda n, l: (0, 0)),           # w0
                pl.BlockSpec((F, 1), lambda n, l: (0, 0)),             # b0
                pl.BlockSpec((1, F, 3 * F), lambda n, l: (l, 0, 0)),   # fused dilated W
                pl.BlockSpec((1, F, 1), lambda n, l: (l, 0, 0)),       # dilated bias
                pl.BlockSpec((1, F, F), lambda n, l: (l, 0, 0)),       # 1x1 W
                pl.BlockSpec((1, F, 1), lambda n, l: (l, 0, 0)),       # 1x1 bias
            ],
            out_specs=pl.BlockSpec((1, F, T), lambda n, l: (n, 0, 0)),
            scratch_shapes=[
                pltpu.VMEM((F, T + 2 * D), jnp.float32),   # padded residual features
                pltpu.VMEM((3 * F, T), jnp.float32),       # stacked taps
            ],
        ),
        compiler_params=pltpu.CompilerParams(
            dimension_semantics=("parallel", "arbitrary"),
            vmem_limit_bytes=32 * 1024 * 1024,
        ),
        cost_estimate=pl.CostEstimate(
            flops=flops, transcendentals=0, bytes_accessed=bytes_accessed),
    )(x_nct, w0, b0, wdil, bdil, w11, b11)
    return out


# --------------------------- pure-JAX reference ---------------------------

def _conv1d_ref(x, w_torch, b, dilation=1, padding=0):
    # x: (N, C, T), w_torch: (Cout, Cin, K), b: (Cout,)
    y = jax.lax.conv_general_dilated(
        x, w_torch, window_strides=(1,), padding=[(padding, padding)],
        rhs_dilation=(dilation,), dimension_numbers=("NCH", "OIH", "NCH"),
        precision=jax.lax.Precision.HIGHEST)
    return y + b[None, :, None]


def single_stage_model_ref(x_nct, params_torch, num_layers):
    w0_t, b0, wdil_t, bdil, w11_t, b11 = params_torch
    out = _conv1d_ref(x_nct, w0_t, b0)
    for i in range(num_layers):
        d = 2 ** i
        h = jax.nn.relu(_conv1d_ref(out, wdil_t[i], bdil[i], dilation=d, padding=d))
        h = _conv1d_ref(h, w11_t[i], b11[i])
        out = out + h
    return out


# --------------------------------- main -----------------------------------

if __name__ == "__main__":
    # Small shapes consistent with the module.
    N, dim_in, T = 2, 4, 16
    num_f_maps, num_layers, num_classes = 32, 3, 5   # conv_out / conv_out_2 unused in forward
    F = num_f_maps
    L = num_layers

    key = jax.random.PRNGKey(0)
    ks = jax.random.split(key, 8)

    # Deterministic synthetic parameters (PyTorch Conv1d weight layout: (Cout, Cin, K)).
    w0_t = jax.random.normal(ks[0], (F, dim_in, 1), jnp.float32) * 0.2
    b0 = jax.random.normal(ks[1], (F,), jnp.float32) * 0.1
    wdil_t = jax.random.normal(ks[2], (L, F, F, 3), jnp.float32) * 0.1
    bdil = jax.random.normal(ks[3], (L, F), jnp.float32) * 0.1
    w11_t = jax.random.normal(ks[4], (L, F, F, 1), jnp.float32) * 0.1
    b11 = jax.random.normal(ks[5], (L, F), jnp.float32) * 0.1

    x = jax.random.normal(ks[6], (N, dim_in, T), jnp.float32)

    # Repack for the kernel (weight-as-LHS, NCW layout, fused dilated taps):
    #   w0   : (F, Cin)
    #   wdil : (L, F, 3F) with column block k*F + c == W[o, c, k]  (taps k = 0,1,2)
    #   w11  : (L, F, F)
    #   biases as (..., F, 1) so they broadcast over the T (lane) axis.
    w0 = w0_t[:, :, 0]                                                  # (F, Cin)
    b0_k = b0[:, None]                                                  # (F, 1)
    wdil = jnp.transpose(wdil_t, (0, 1, 3, 2)).reshape(L, F, 3 * F)     # (L, F, 3F)
    bdil_k = bdil[:, :, None]                                           # (L, F, 1)
    w11 = w11_t[:, :, :, 0]                                             # (L, F, F)
    b11_k = b11[:, :, None]                                             # (L, F, 1)

    out = single_stage_model_pallas(
        x, (w0, b0_k, wdil, bdil_k, w11, b11_k), num_layers)
    out = jax.block_until_ready(out)

    ref = single_stage_model_ref(x, (w0_t, b0, wdil_t, bdil, w11_t, b11), num_layers)
    ref = jax.block_until_ready(ref)

    assert out.shape == (N, F, T), out.shape
    max_err = float(jnp.max(jnp.abs(out - ref)))
    assert jnp.allclose(out, ref, atol=2e-3, rtol=2e-3), max_err

    print("KERNEL_OK")
</pallas_src>

<mosaic_0001>
module attributes {stable_mosaic.version = 11 : i64} {
  func.func @_ssm_kernel(%arg0: i32, %arg1: i32, %arg2: memref<1x4x16xf32, #tpu.memory_space<vmem>>, %arg3: memref<32x4xf32, #tpu.memory_space<vmem>>, %arg4: memref<32x1xf32, #tpu.memory_space<vmem>>, %arg5: memref<1x32x96xf32, #tpu.memory_space<vmem>>, %arg6: memref<1x32x1xf32, #tpu.memory_space<vmem>>, %arg7: memref<1x32x32xf32, #tpu.memory_space<vmem>>, %arg8: memref<1x32x1xf32, #tpu.memory_space<vmem>>, %arg9: memref<1x32x16xf32, #tpu.memory_space<vmem>>, %arg10: memref<32x24xf32, #tpu.memory_space<vmem>>, %arg11: memref<96x16xf32, #tpu.memory_space<vmem>>) attributes {dimension_semantics = [#tpu.dimension_semantics<parallel>, #tpu.dimension_semantics<arbitrary>], iteration_bounds = array<i64: 2, 3>, scalar_prefetch = 0 : i64, scratch_operands = 2 : i64, tpu.core_type = #tpu.core_type<tc>, window_params = [{transform_indices = @transform_0, window_bounds = array<i64: 1, 4, 16>}, {pipeline_mode = #tpu.pipeline_mode<synchronous>, transform_indices = @transform_1, window_bounds = array<i64: 32, 4>}, {pipeline_mode = #tpu.pipeline_mode<synchronous>, transform_indices = @transform_2, window_bounds = array<i64: 32, 1>}, {transform_indices = @transform_3, window_bounds = array<i64: 1, 32, 96>}, {transform_indices = @transform_4, window_bounds = array<i64: 1, 32, 1>}, {transform_indices = @transform_5, window_bounds = array<i64: 1, 32, 32>}, {transform_indices = @transform_6, window_bounds = array<i64: 1, 32, 1>}, {transform_indices = @transform_7, window_bounds = array<i64: 1, 32, 16>}]} {
    %c0_i32 = arith.constant 0 : i32
    %0 = arith.cmpi eq, %arg1, %c0_i32 : i32
    %1 = arith.extui %0 : i1 to i32
    %c0_i32_0 = arith.constant 0 : i32
    %2 = arith.cmpi ne, %1, %c0_i32_0 : i32
    scf.if %2 {
      %cst_26 = arith.constant 0.000000e+00 : f32
      %36 = vector.broadcast %cst_26 : f32 to vector<32x24xf32>
      %c0_27 = arith.constant 0 : index
      %c0_28 = arith.constant 0 : index
      %37 = vector.load %arg10[%c0_27, %c0_28] : memref<32x24xf32, #tpu.memory_space<vmem>>, vector<32x24xf32>
      tpu.vector_store %arg10[%c0_27, %c0_28], %36 {strides = array<i32>} : memref<32x24xf32, #tpu.memory_space<vmem>>, vector<32x24xf32>,
      %c0_29 = arith.constant 0 : index
      %c0_30 = arith.constant 0 : index
      %38 = vector.load %arg3[%c0_29, %c0_30] : memref<32x4xf32, #tpu.memory_space<vmem>>, vector<32x4xf32>
      %c0_31 = arith.constant 0 : index
      %c0_32 = arith.constant 0 : index
      %c0_33 = arith.constant 0 : index
      %39 = vector.load %arg2[%c0_31, %c0_32, %c0_33] : memref<1x4x16xf32, #tpu.memory_space<vmem>>, vector<1x4x16xf32>
      %40 = vector.shape_cast %39 : vector<1x4x16xf32> to vector<4x16xf32>
      %cst_34 = arith.constant dense<0.000000e+00> : vector<32x16xf32>
      %41 = tpu.matmul %38, %40, %cst_34 {dimension_numbers = #tpu.dot_dimension_numbers<[1], [0], [0], [1], [0, 0, 1, 1], [], []>, precision = #tpu.contract_precision<fp32>} : vector<32x4xf32>, vector<4x16xf32>, vector<32x16xf32> -> vector<32x16xf32>
      %c0_35 = arith.constant 0 : index
      %c0_36 = arith.constant 0 : index
      %42 = vector.load %arg4[%c0_35, %c0_36] : memref<32x1xf32, #tpu.memory_space<vmem>>, vector<32x1xf32>
      %43 = vector.broadcast %42 : vector<32x1xf32> to vector<32x16xf32>
      %44 = arith.addf %41, %43 : vector<32x16xf32>
      %c0_37 = arith.constant 0 : index
      %c4_38 = arith.constant 4 : index
      %45 = vector.load %arg10[%c0_37, %c4_38] : memref<32x24xf32, #tpu.memory_space<vmem>>, vector<32x16xf32>
      tpu.vector_store %arg10[%c0_37, %c4_38], %44 {strides = array<i32>} : memref<32x24xf32, #tpu.memory_space<vmem>>, vector<32x16xf32>,
    } else {
    }
    %c0 = arith.constant 0 : index
    %c4 = arith.constant 4 : index
    %3 = vector.load %arg10[%c0, %c4] : memref<32x24xf32, #tpu.memory_space<vmem>>, vector<32x16xf32>
    %c32 = arith.constant 32 : index
    %c0_1 = arith.constant 0 : index
    %4 = vector.load %arg11[%c32, %c0_1] : memref<96x16xf32, #tpu.memory_space<vmem>>, vector<32x16xf32>
    tpu.vector_store %arg11[%c32, %c0_1], %3 {strides = array<i32>} : memref<96x16xf32, #tpu.memory_space<vmem>>, vector<32x16xf32>,
    %c0_i32_2 = arith.constant 0 : i32
    %5 = arith.cmpi eq, %arg1, %c0_i32_2 : i32
    %6 = arith.extui %5 : i1 to i32
    %c0_i32_3 = arith.constant 0 : i32
    %7 = arith.cmpi ne, %6, %c0_i32_3 : i32
    scf.if %7 {
      %c0_26 = arith.constant 0 : index
      %c3 = arith.constant 3 : index
      %36 = vector.load %arg10[%c0_26, %c3] : memref<32x24xf32, #tpu.memory_space<vmem>>, vector<32x16xf32>
      %c0_27 = arith.constant 0 : index
      %c0_28 = arith.constant 0 : index
      %37 = vector.load %arg11[%c0_27, %c0_28] : memref<96x16xf32, #tpu.memory_space<vmem>>, vector<32x16xf32>
      tpu.vector_store %arg11[%c0_27, %c0_28], %36 {strides = array<i32>} : memref<96x16xf32, #tpu.memory_space<vmem>>, vector<32x16xf32>,
      %c0_29 = arith.constant 0 : index
      %c5 = arith.constant 5 : index
      %38 = vector.load %arg10[%c0_29, %c5] : memref<32x24xf32, #tpu.memory_space<vmem>>, vector<32x16xf32>
      %c64 = arith.constant 64 : index
      %c0_30 = arith.constant 0 : index
      %39 = vector.load %arg11[%c64, %c0_30] : memref<96x16xf32, #tpu.memory_space<vmem>>, vector<32x16xf32>
      tpu.vector_store %arg11[%c64, %c0_30], %38 {strides = array<i32>} : memref<96x16xf32, #tpu.memory_space<vmem>>, vector<32x16xf32>,
    } else {
    }
    %c1_i32 = arith.constant 1 : i32
    %8 = arith.cmpi eq, %arg1, %c1_i32 : i32
    %9 = arith.extui %8 : i1 to i32
    %c0_i32_4 = arith.constant 0 : i32
    %10 = arith.cmpi ne, %9, %c0_i32_4 : i32
    scf.if %10 {
      %c0_26 = arith.constant 0 : index
      %c2 = arith.constant 2 : index
      %36 = vector.load %arg10[%c0_26, %c2] : memref<32x24xf32, #tpu.memory_space<vmem>>, vector<32x16xf32>
      %c0_27 = arith.constant 0 : index
      %c0_28 = arith.constant 0 : index
      %37 = vector.load %arg11[%c0_27, %c0_28] : memref<96x16xf32, #tpu.memory_space<vmem>>, vector<32x16xf32>
      tpu.vector_store %arg11[%c0_27, %c0_28], %36 {strides = array<i32>} : memref<96x16xf32, #tpu.memory_space<vmem>>, vector<32x16xf32>,
      %c0_29 = arith.constant 0 : index
      %c6 = arith.constant 6 : index
      %38 = vector.load %arg10[%c0_29, %c6] : memref<32x24xf32, #tpu.memory_space<vmem>>, vector<32x16xf32>
      %c64 = arith.constant 64 : index
      %c0_30 = arith.constant 0 : index
      %39 = vector.load %arg11[%c64, %c0_30] : memref<96x16xf32, #tpu.memory_space<vmem>>, vector<32x16xf32>
      tpu.vector_store %arg11[%c64, %c0_30], %38 {strides = array<i32>} : memref<96x16xf32, #tpu.memory_space<vmem>>, vector<32x16xf32>,
    } else {
    }
    %c2_i32 = arith.constant 2 : i32
    %11 = arith.cmpi eq, %arg1, %c2_i32 : i32
    %12 = arith.extui %11 : i1 to i32
    %c0_i32_5 = arith.constant 0 : i32
    %13 = arith.cmpi ne, %12, %c0_i32_5 : i32
    scf.if %13 {
      %c0_26 = arith.constant 0 : index
      %c0_27 = arith.constant 0 : index
      %36 = vector.load %arg10[%c0_26, %c0_27] : memref<32x24xf32, #tpu.memory_space<vmem>>, vector<32x16xf32>
      %c0_28 = arith.constant 0 : index
      %c0_29 = arith.constant 0 : index
      %37 = vector.load %arg11[%c0_28, %c0_29] : memref<96x16xf32, #tpu.memory_space<vmem>>, vector<32x16xf32>
      tpu.vector_store %arg11[%c0_28, %c0_29], %36 {strides = array<i32>} : memref<96x16xf32, #tpu.memory_space<vmem>>, vector<32x16xf32>,
      %c0_30 = arith.constant 0 : index
      %c8 = arith.constant 8 : index
      %38 = vector.load %arg10[%c0_30, %c8] : memref<32x24xf32, #tpu.memory_space<vmem>>, vector<32x16xf32>
      %c64 = arith.constant 64 : index
      %c0_31 = arith.constant 0 : index
      %39 = vector.load %arg11[%c64, %c0_31] : memref<96x16xf32, #tpu.memory_space<vmem>>, vector<32x16xf32>
      tpu.vector_store %arg11[%c64, %c0_31], %38 {strides = array<i32>} : memref<96x16xf32, #tpu.memory_space<vmem>>, vector<32x16xf32>,
    } else {
    }
    %c0_6 = arith.constant 0 : index
    %c0_7 = arith.constant 0 : index
    %c0_8 = arith.constant 0 : index
    %14 = vector.load %arg5[%c0_6, %c0_7, %c0_8] : memref<1x32x96xf32, #tpu.memory_space<vmem>>, vector<1x32x96xf32>
    %15 = vector.shape_cast %14 : vector<1x32x96xf32> to vector<32x96xf32>
    %c0_9 = arith.constant 0 : index
    %c0_10 = arith.constant 0 : index
    %16 = vector.load %arg11[%c0_9, %c0_10] : memref<96x16xf32, #tpu.memory_space<vmem>>, vector<96x16xf32>
    %cst = arith.constant dense<0.000000e+00> : vector<32x16xf32>
    %17 = tpu.matmul %15, %16, %cst {dimension_numbers = #tpu.dot_dimension_numbers<[1], [0], [0], [1], [0, 0, 1, 1], [], []>, precision = #tpu.contract_precision<fp32>} : vector<32x96xf32>, vector<96x16xf32>, vector<32x16xf32> -> vector<32x16xf32>
    %c0_11 = arith.constant 0 : index
    %c0_12 = arith.constant 0 : index
    %c0_13 = arith.constant 0 : index
    %18 = vector.load %arg6[%c0_11, %c0_12, %c0_13] : memref<1x32x1xf32, #tpu.memory_space<vmem>>, vector<1x32x1xf32>
    %19 = vector.shape_cast %18 : vector<1x32x1xf32> to vector<32x1xf32>
    %20 = vector.broadcast %19 : vector<32x1xf32> to vector<32x16xf32>
    %21 = arith.addf %17, %20 : vector<32x16xf32>
    %cst_14 = arith.constant 0.000000e+00 : f32
    %22 = vector.broadcast %cst_14 : f32 to vector<32x16xf32>
    %23 = arith.maximumf %21, %22 : vector<32x16xf32>
    %c0_15 = arith.constant 0 : index
    %c0_16 = arith.constant 0 : index
    %c0_17 = arith.constant 0 : index
    %24 = vector.load %arg7[%c0_15, %c0_16, %c0_17] : memref<1x32x32xf32, #tpu.memory_space<vmem>>, vector<1x32x32xf32>
    %25 = vector.shape_cast %24 : vector<1x32x32xf32> to vector<32x32xf32>
    %cst_18 = arith.constant dense<0.000000e+00> : vector<32x16xf32>
    %26 = tpu.matmul %25, %23, %cst_18 {dimension_numbers = #tpu.dot_dimension_numbers<[1], [0], [0], [1], [0, 0, 1, 1], [], []>, precision = #tpu.contract_precision<fp32>} : vector<32x32xf32>, vector<32x16xf32>, vector<32x16xf32> -> vector<32x16xf32>
    %c0_19 = arith.constant 0 : index
    %c0_20 = arith.constant 0 : index
    %c0_21 = arith.constant 0 : index
    %27 = vector.load %arg8[%c0_19, %c0_20, %c0_21] : memref<1x32x1xf32, #tpu.memory_space<vmem>>, vector<1x32x1xf32>
    %28 = vector.shape_cast %27 : vector<1x32x1xf32> to vector<32x1xf32>
    %29 = vector.broadcast %28 : vector<32x1xf32> to vector<32x16xf32>
    %30 = arith.addf %26, %29 : vector<32x16xf32>
    %31 = arith.addf %3, %30 : vector<32x16xf32>
    %c0_22 = arith.constant 0 : index
    %c4_23 = arith.constant 4 : index
    %32 = vector.load %arg10[%c0_22, %c4_23] : memref<32x24xf32, #tpu.memory_space<vmem>>, vector<32x16xf32>
    tpu.vector_store %arg10[%c0_22, %c4_23], %31 {strides = array<i32>} : memref<32x24xf32, #tpu.memory_space<vmem>>, vector<32x16xf32>,
    %c2_i32_24 = arith.constant 2 : i32
    %33 = arith.cmpi eq, %arg1, %c2_i32_24 : i32
    %34 = arith.extui %33 : i1 to i32
    %c0_i32_25 = arith.constant 0 : i32
    %35 = arith.cmpi ne, %34, %c0_i32_25 : i32
    scf.if %35 {
      %c0_26 = arith.constant 0 : index
      %c4_27 = arith.constant 4 : index
      %36 = vector.load %arg10[%c0_26, %c4_27] : memref<32x24xf32, #tpu.memory_space<vmem>>, vector<32x16xf32>
      %c0_28 = arith.constant 0 : index
      %c0_29 = arith.constant 0 : index
      %c0_30 = arith.constant 0 : index
      %37 = vector.load %arg9[%c0_28, %c0_29, %c0_30] : memref<1x32x16xf32, #tpu.memory_space<vmem>>, vector<1x32x16xf32>
      %38 = vector.shape_cast %37 : vector<1x32x16xf32> to vector<32x16xf32>
      %39 = vector.shape_cast %36 : vector<32x16xf32> to vector<1x32x16xf32>
      tpu.vector_store %arg9[%c0_28, %c0_29, %c0_30], %39 {strides = array<i32>} : memref<1x32x16xf32, #tpu.memory_space<vmem>>, vector<1x32x16xf32>,
    } else {
    }
    return
  }
  func.func @transform_0(%arg0: i32, %arg1: i32) -> (i32, i32, i32) {
    %c0_i32 = arith.constant 0 : i32
    %c0_i32_0 = arith.constant 0 : i32
    %c0_i32_1 = arith.constant 0 : i32
    return %arg0, %c0_i32, %c0_i32_0 : i32, i32, i32
  }
  func.func @transform_1(%arg0: i32, %arg1: i32) -> (i32, i32) {
    %c0_i32 = arith.constant 0 : i32
    %c0_i32_0 = arith.constant 0 : i32
    %c0_i32_1 = arith.constant 0 : i32
    return %c0_i32, %c0_i32_0 : i32, i32
  }
  func.func @transform_2(%arg0: i32, %arg1: i32) -> (i32, i32) {
    %c0_i32 = arith.constant 0 : i32
    %c0_i32_0 = arith.constant 0 : i32
    %c0_i32_1 = arith.constant 0 : i32
    return %c0_i32, %c0_i32_0 : i32, i32
  }
  func.func @transform_3(%arg0: i32, %arg1: i32) -> (i32, i32, i32) {
    %c0_i32 = arith.constant 0 : i32
    %c0_i32_0 = arith.constant 0 : i32
    %c0_i32_1 = arith.constant 0 : i32
    return %arg1, %c0_i32, %c0_i32_0 : i32, i32, i32
  }
  func.func @transform_4(%arg0: i32, %arg1: i32) -> (i32, i32, i32) {
    %c0_i32 = arith.constant 0 : i32
    %c0_i32_0 = arith.constant 0 : i32
    %c0_i32_1 = arith.constant 0 : i32
    return %arg1, %c0_i32, %c0_i32_0 : i32, i32, i32
  }
  func.func @transform_5(%arg0: i32, %arg1: i32) -> (i32, i32, i32) {
    %c0_i32 = arith.constant 0 : i32
    %c0_i32_0 = arith.constant 0 : i32
    %c0_i32_1 = arith.constant 0 : i32
    return %arg1, %c0_i32, %c0_i32_0 : i32, i32, i32
  }
  func.func @transform_6(%arg0: i32, %arg1: i32) -> (i32, i32, i32) {
    %c0_i32 = arith.constant 0 : i32
    %c0_i32_0 = arith.constant 0 : i32
    %c0_i32_1 = arith.constant 0 : i32
    return %arg1, %c0_i32, %c0_i32_0 : i32, i32, i32
  }
  func.func @transform_7(%arg0: i32, %arg1: i32) -> (i32, i32, i32) {
    %c0_i32 = arith.constant 0 : i32
    %c0_i32_0 = arith.constant 0 : i32
    %c0_i32_1 = arith.constant 0 : i32
    return %arg0, %c0_i32, %c0_i32_0 : i32, i32, i32
  }
}

</mosaic_0001>

<bundles_post_ra>
// kernel: tpu_custom_call.1
= control target key start
LH: loop header
LB: loop body
LE: loop exit
PB: predicated region body
PF: predicated region fallthrough
CT: control target
= control target key end

     0   :  { %s3705_s24 = smov 0   ;;  %s3707_s25 = smov 0   ;;  %s4181_s0 = inlined_call_operand.vmem [shape: f32[2,4,16], index: 0, kind: input, shape index: {}]   ;;  %s4182_s1 = inlined_call_operand.vmem [shape: f32[32,4], index: 1, kind: input, shape index: {}]   ;;  %s4183_s2 = inlined_call_operand.vmem [shape: f32[32,1], index: 2, kind: input, shape index: {}]   ;;  %s4184_s3 = inlined_call_operand.vmem [shape: f32[3,32,96], index: 3, kind: input, shape index: {}]   ;;  %s4185_s4 = inlined_call_operand.vmem [shape: f32[3,32,1], index: 4, kind: input, shape index: {}]   ;;  %s4186_s5 = inlined_call_operand.vmem [shape: f32[3,32,32], index: 5, kind: input, shape index: {}]   ;;  %s4187_s6 = inlined_call_operand.vmem [shape: f32[3,32,1], index: 6, kind: input, shape index: {}]   ;;  %s4188_s7 = inlined_call_operand.vmem [shape: f32[2,32,16], index: 7, kind: output, shape index: {}]  }
   0x1   :  { %s3709_s26 = smov 0   ;;  %s3711_s27 = smov 0  }
   0x2   :  { %s3713_s28 = smov 0  }
   0x3 LB: > { %s26_s29 = sadd.s32 1, %s3643_s26  ;;  %s29_s30 = sadd.s32 1, %s3647_s27  ;;  %s3651_s28 = sphi %s3713_s28, %s17_s28   ;;  %s3647_s27 = sphi %s3711_s27, %s4194_s27   ;;  %s3643_s26 = sphi %s3709_s26, %s4193_s26   ;;  %s3639_s25 = sphi %s3707_s25, %s4192_s25   ;;  %s3635_s24 = sphi %s3705_s24, %s4191_s24  }
   0x4   : > { %p27_p0 = scmp.ge.s32.totalorder %s26_s29, 3  ;;  %p2783_p1 = scmp.ge.s32.totalorder %s3651_s28, 1 }
   0x5   : > { %p288_p2 = scmp.lt.s32.totalorder %s3651_s28, 7 }
   0x6   : > { %s4196_s29 = smov (%p27_p0, %s26_s29), 0  ;;  %s4198_s30 = smov (!%p27_p0, %s29_s30), %s3647_s27 }
   0x7   : > { %p289_p3 = pnand %p2783_p1, %p288_p2  ;;  %p31_p4 = scmp.ge.s32.totalorder %s4198_s30, 2 }
   0x8   : > { %p339_p5 = scmp.lt.s32.totalorder (!%p289_p3), %s3639_s25, 1  ;;  %p343_p6 = scmp.lt.s32.totalorder (!%p289_p3), %s3635_s24, 2 }
   0x9   : > { %s4200_s30 = smov (%p31_p4, %s4198_s30), 0  ;;  %292 = sbr.rel (%p289_p3) target bundleno = 1616 (0x650), region = 48 }
   0xa   : > { %4189 = sst [smem:[#allocation4_spill]] %s4200_s30  ;;  %p2795_p7 = scmp.ne.s32.totalorder (!%p289_p3), %s3635_s24, 0 }
  0x10   : > { %s4202_s25 = smov (!%p339_p5, %s3639_s25), 1  ;;  %371 = sbr.rel (%p2795_p7) target bundleno = 384 (0x180), region = 52 }
  0x11   : > { %s344_s8 = scalar_select %p343_p6, %s3635_s24, 2 }
  0x12   : > { %s2784_s9 = sshll.u32 %s4202_s25, 2  ;;  %s2806_s10 = sshll.u32 %s4202_s25, 5  ;;  %vm419_vm0 = vcmask (!%p2795_p7), 1043456   ;;  %v377_v1 = vld [vmem:[%s4182_s1] sm:$0xff] (!%p2795_p7)  ;;  %vm406_vm1 = vcmask (!%p2795_p7), 31744   ;;  %v378_v2 = vld [vmem:[%s4182_s1 + $0x8] sm:$0xff] (!%p2795_p7) }
  0x13   : > { %s342_s13 = scalar_lea.vmem %s4181_s0, %s2784_s9  ;;  %s2802_s14 = sshll.u32 %s344_s8, 5  ;;  %v408_v4 = vsel (!%p2795_p7), %vm406_vm1, %v377_v1, 0  ;;  %v411_v5 = vsel (!%p2795_p7), %vm406_vm1, %v378_v2, 0  ;;  %v379_v6 = vld [vmem:[%s4182_s1 + $0x10] sm:$0xff] (!%p2795_p7)  ;;  %v380_v7 = vld [vmem:[%s4182_s1 + $0x18] sm:$0xff] (!%p2795_p7)  ;;  %v3653_v12 = vmov (!%p2795_p7), 0  }
  0x14   : > { %s3745_s17 = scalar_lea.vmem %s4184_s3, %s2802_s14  ;;  %s3750_s20 = scalar_lea.vmem %s4185_s4, %s2802_s14  ;;  %v381_v0 = vld [vmem:[%s342_s13] sm:$0xf] (!%p2795_p7)  ;;  %v3784_v9 = vand.u32 (!%p2795_p7), 4294901760, %v408_v4  ;;  %v3786_v10 = vand.u32 (!%p2795_p7), 4294901760, %v411_v5  ;;  %v414_v11 = vsel (!%p2795_p7), %vm406_vm1, %v379_v6, 0  ;;  %3609 = vset.pattern.permute.xlu0 (!%p2795_p7), %v3653_v12  ;;  %3610 = vset.pattern.permute.xlu1 (!%p2795_p7), %v3653_v12  ;;  %v384_v14 = vld [vmem:[%s4183_s2 + $0x10] sm:$0xff] (!%p2795_p7) }
  0x15   : > { %s3755_s23 = scalar_lea.vmem %s4186_s5, %s2802_s14  ;;  %s3760_s9 = scalar_lea.vmem %s4187_s6, %s2802_s14  ;;  %v421_v3 = vsel (!%p2795_p7), %vm419_vm0, %v381_v0, 0  ;;  %v382_v13 = vld [vmem:[%s4183_s2] sm:$0xff] (!%p2795_p7)  ;;  %v509_v15 = vand.u32 (!%p2795_p7), 4294901760, %v414_v11  ;;  %v417_v16 = vsel (!%p2795_p7), %vm406_vm1, %v380_v7, 0  ;;  %398 = vperm.xlu1 (!%p2795_p7), %3610, %v384_v14   ;;  %v383_v21 = vld [vmem:[%s4183_s2 + $0x8] sm:$0xff] (!%p2795_p7)  ;;  %v385_v22 = vld [vmem:[%s4183_s2 + $0x18] sm:$0xff] (!%p2795_p7) }
  0x16   : > { %s3765_s12 = scalar_lea.vmem %s4188_s7, %s2806_s10  ;;  %v424_v8 = vand.u32 (!%p2795_p7), 4294901760, %v421_v3  ;;  %388 = vperm.xlu0 (!%p2795_p7), %3609, %v382_v13   ;;  %v490_v17 = vsub.f32 (!%p2795_p7), %v408_v4, %v3784_v9  ;;  %v500_v18 = vsub.f32 (!%p2795_p7), %v411_v5, %v3786_v10  ;;  %v519_v20 = vand.u32 (!%p2795_p7), 4294901760, %v417_v16  ;;  %s3655_s14 = smov (!%p2795_p7), 4  }
  0x17   : > { %v510_v23 = vsub.f32 %v414_v11, %v509_v15  ;;  %vm372_vm2 = vcmask 195584   ;;  %v3654_v40 = vmov 0.0   ;;  %vm1014_vm3 = vcmask 162848  }
  0x18   : > { %3005 = vmatprep.subr.mxu0 %v424_v8  ;;  %2981 = vmatprep.subr.mxu1 %v424_v8  ;;  %v531_v19 = vsub.f32 %v421_v3, %v424_v8  ;;  %v491_v24 = vand.u32 4294901760, %v490_v17  ;;  %v501_v25 = vand.u32 4294901760, %v500_v18  ;;  %v520_v27 = vsub.f32 %v417_v16, %v519_v20  ;;  %374 = vst.msk [vmem:[#allocation2 + $0x8] sm:$0xff] %vm372_vm2, %v3654_v40 }
  0x19   : > { %3006 = vmatpush3.msra.mxu0 %v424_v8  ;;  %2982 = vmatpush3.msra.mxu1 %v424_v8  ;;  %v511_v28 = vand.u32 4294901760, %v510_v23  ;;  %373 = vst.msk [vmem:[#allocation2] sm:$0xff] %vm372_vm2, %v3654_v40  ;;  %375 = vst.msk [vmem:[#allocation2 + $0x10] sm:$0xff] %vm372_vm2, %v3654_v40 }
  0x1a   : > { %v532_v26 = vand.u32 4294901760, %v531_v19  ;;  %393 = vperm.xlu0 %3609, %v383_v21   ;;  %403 = vperm.xlu1 %3610, %v385_v22   ;;  %v492_v29 = vsub.f32 %v490_v17, %v491_v24  ;;  %v502_v31 = vsub.f32 %v500_v18, %v501_v25  ;;  %v521_v32 = vand.u32 4294901760, %v520_v27  ;;  %376 = vst.msk [vmem:[#allocation2 + $0x18] sm:$0xff] %vm372_vm2, %v3654_v40 }
  0x1b   : > { %3007 = vmatprep.mubr.f32.mxu0 %v491_v24  ;;  %v512_v33 = vsub.f32 %v510_v23, %v511_v28 }
  0x1c   : > { %v533_v30 = vsub.f32 %v531_v19, %v532_v26  ;;  %3013 = vmatprep.subr.mxu0 %v532_v26  ;;  %3008 = vmatmul.mubr.f32.vlgmr.msra.gmra.mrb[0].mxu0 %v501_v25  ;;  %v493_v34 = vand.u32 4294901760, %v492_v29  ;;  %v503_v36 = vand.u32 4294901760, %v502_v31  ;;  %v522_v37 = vsub.f32 %v520_v27, %v521_v32 }
  0x1d   : > { %3010 = vmatprep.mubr.f32.mxu0 %v511_v28  ;;  %3014 = vmatpush3.msra.mxu0 %v532_v26  ;;  %v513_v38 = vand.u32 4294901760, %v512_v33 }
  0x1e   : > { %v534_v35 = vand.u32 4294901760, %v533_v30  ;;  %3021 = vmatprep.subr.mxu0 %v424_v8  ;;  %2983 = vmatprep.mubr.f32.mxu1 %v493_v34  ;;  %v523_v39 = vand.u32 4294901760, %v522_v37 }
  0x1f   : > { %2984 = vmatmul.mubr.f32.vlgmr.msra.gmra.mrb[0].mxu1 %v503_v36 }
  0x20   : > { %2989 = vmatprep.subr.mxu1 %v534_v35  ;;  %3011 = vmatmul.mubr.f32.gmra.mrb[2].mxu0 %v521_v32 }
  0x21   : > { %2990 = vmatpush3.msra.mxu1 %v534_v35  ;;  %2986 = vmatprep.mubr.f32.mxu1 %v513_v38 }
  0x22   : > { %3015 = vmatprep.mubr.f32.mxu0 %v3784_v9  ;;  %2997 = vmatprep.subr.mxu1 %v531_v19 }
  0x23   : > { %2987 = vmatmul.mubr.f32.gmra.mrb[2].mxu1 %v523_v39 }
  0x24   : > { %3016 = vmatmul.mubr.f32.vlgmr.msra.gmra.mrb[0].mxu0 %v3786_v10  ;;  %2991 = vmatprep.mubr.f32.mxu1 %v3784_v9 }
  0x25   : > { %3018 = vmatprep.mubr.f32.mxu0 %v509_v15  ;;  %3022 = vmatpush3.msra.mxu0 %v424_v8 }
  0x27   : > { %2992 = vmatmul.mubr.f32.vlgmr.msra.gmra.mrb[0].mxu1 %v3786_v10 }
  0x28   : > { %3019 = vmatmul.mubr.f32.gmra.mrb[2].mxu0 %v519_v20  ;;  %2998 = vmatpush3.msra.mxu1 %v531_v19 }
  0x29   : > { %2994 = vmatprep.mubr.f32.mxu1 %v509_v15  ;;  %3023 = vmatprep.mubr.f32.mxu0 %v3784_v9 }
  0x2b   : > { %2995 = vmatmul.mubr.f32.gmra.mrb[2].mxu1 %v519_v20 }
  0x2c   : > { %3024 = vmatmul.mubr.f32.vlgmr.msra.gmra.mrb[0].mxu0 %v3786_v10  ;;  %2999 = vmatprep.mubr.f32.mxu1 %v490_v17 }
  0x2d   : > { %3026 = vmatprep.mubr.f32.mxu0 %v509_v15 }
  0x2f   : > { %3000 = vmatmul.mubr.f32.vlgmr.msra.gmra.mrb[0].mxu1 %v500_v18 }
  0x30   : > { %3027 = vmatmul.mubr.f32.gmra.mrb[2].mxu0 %v519_v20  ;;  %3002 = vmatprep.mubr.f32.mxu1 %v510_v23 }
  0x33   : > { %3003 = vmatmul.mubr.f32.gmra.mrb[2].mxu1 %v520_v27 }
  0x94   : > { %v399_v44 = vpop.permute.xlu1 %398 }
  0x95   : > { %v389_v41 = vpop.permute.xlu0 %388 }
  0x99   : > { %v394_v45 = vpop.permute.xlu0 %393  ;;  %v404_v53 = vpop.permute.xlu1 %403 }
  0xff   : > { %v3025_v42 = vpop.f32.mrb[0].mxu0 }
 0x100   : > { %v976_v43 = vpop.f32.mrb[1].mxu0 }
 0x102   : > { %v3001_v46 = vpop.f32.mrb[0].mxu1 }
 0x103   : > { %v3028_v47 = vpop.f32.mrb[2].mxu0  ;;  %v3485_v48 = vadd.f32 %v3001_v46, %v394_v45  ;;  %v693_v49 = vpop.f32.mrb[1].mxu1 }
 0x104   : > { %v988_v50 = vpop.f32.mrb[3].mxu0  ;;  %v3487_v51 = vadd.f32 %v693_v49, %v389_v41 }
 0x105   : > { %v3486_v52 = vadd.f32 %v3485_v48, %v3025_v42 }
 0x106   : > { %v3488_v54 = vadd.f32 %v3487_v51, %v976_v43  ;;  %v3004_v55 = vpop.f32.mrb[2].mxu1 }
 0x107   : > { %v3489_v56 = vadd.f32 %v3004_v55, %v404_v53  ;;  %1004 = vrot.lane.b32.xlu1 %v3486_v52, %s3655_s14  ;;  %v707_v57 = vpop.f32.mrb[3].mxu1 }
 0x108   : > { %v3491_v58 = vadd.f32 %v707_v57, %v399_v44  ;;  %1002 = vrot.lane.b32.xlu0 %v3488_v54, %s3655_s14 }
 0x109   : > { %v3490_v59 = vadd.f32 %v3489_v56, %v3028_v47 }
 0x10a   : > { %v3492_v60 = vadd.f32 %v3491_v58, %v988_v50 }
 0x10b   : > { %1008 = vrot.lane.b32.xlu1 %v3490_v59, %s3655_s14 }
 0x10c   : > { %1006 = vrot.lane.b32.xlu0 %v3492_v60, %s3655_s14 }
 0x179   : > { %v1005_v61 = vpop.permute.xlu1 %1004 }
 0x17a   : > { %1016 = vst.msk [vmem:[#allocation2 + $0x8] sm:$0xff] %vm1014_vm3, %v1005_v61  ;;  %v1003_v62 = vpop.permute.xlu0 %1002 }
 0x17b   : > { %1015 = vst.msk [vmem:[#allocation2] sm:$0xff] %vm1014_vm3, %v1003_v62 }
 0x17d   : > { %v1009_v63 = vpop.permute.xlu1 %1008 }
 0x17e   : > { %1018 = vst.msk [vmem:[#allocation2 + $0x18] sm:$0xff] %vm1014_vm3, %v1009_v63  ;;  %v1007_v0 = vpop.permute.xlu0 %1006 }
 0x17f   : > { %1017 = vst.msk [vmem:[#allocation2 + $0x10] sm:$0xff] %vm1014_vm3, %v1007_v0 }
 0x180 PF: > { %s3656_s10 = smov 124   ;;  %vm1039_vm4 = vcmask 130048   ;;  %s3657_s18 = smov (!%p2795_p7), 125  }
 0x181   : > { %v3818_v4 = vld [vmem:[#allocation2 + $0x8] sm:$0xff]  ;;  %s3658_s13 = smov (!%p2795_p7), 123  }
 0x182   : > { %v3812_v2 = vld [vmem:[#allocation2] sm:$0xff]  ;;  %v1048_v12 = vld [vmem:[#allocation2 + $0x8] sm:$0xff] (!%p2795_p7) }
 0x183   : > { %1027 = vrot.lane.b32.xlu0 %v3812_v2, %s3656_s10  ;;  %v1047_v10 = vld [vmem:[#allocation2] sm:$0xff] (!%p2795_p7) }
 0x185   : > { %v3816_v3 = vld [vmem:[#allocation2 + $0x18] sm:$0xff] }
 0x186   : > { %v3810_v1 = vld [vmem:[#allocation2 + $0x10] sm:$0xff]  ;;  %v1050_v11 = vld [vmem:[#allocation2 + $0x18] sm:$0xff] (!%p2795_p7) }
 0x187   : > { %1031 = vrot.lane.b32.xlu1 %v3810_v1, %s3656_s10  ;;  %1029 = vrot.lane.b32.xlu0 %v3818_v4, %s3656_s10  ;;  %v1049_v9 = vld [vmem:[#allocation2 + $0x10] sm:$0xff] (!%p2795_p7) }
 0x18b   : > { %1033 = vrot.lane.b32.xlu1 %v3816_v3, %s3656_s10  ;;  %1055 = vrot.lane.b32.xlu0 (!%p2795_p7), %v1047_v10, %s3657_s18 }
 0x18f   : > { %1059 = vrot.lane.b32.xlu1 (!%p2795_p7), %v1049_v9, %s3657_s18  ;;  %1057 = vrot.lane.b32.xlu0 (!%p2795_p7), %v1048_v12, %s3657_s18 }
 0x193   : > { %1061 = vrot.lane.b32.xlu1 (!%p2795_p7), %v1050_v11, %s3657_s18  ;;  %1079 = vrot.lane.b32.xlu0 (!%p2795_p7), %v1047_v10, %s3658_s13 }
 0x197   : > { %1081 = vrot.lane.b32.xlu1 (!%p2795_p7), %v1048_v12, %s3658_s13  ;;  %1083 = vrot.lane.b32.xlu0 (!%p2795_p7), %v1049_v9, %s3658_s13 }
 0x19b   : > { %1085 = vrot.lane.b32.xlu1 (!%p2795_p7), %v1050_v11, %s3658_s13 }
 0x1f5   : > { %v1028_v6 = vpop.permute.xlu0 %1027 }
 0x1f6   : > { %1040 = vst.msk [vmem:[#allocation3 + $0x20] sm:$0xff] %vm1039_vm4, %v1028_v6 }
 0x1f8   : > { %1046 = sbr.rel (%p2795_p7) target bundleno = 527 (0x20f), region = 56 }
 0x1f9   : > { %v1032_v5 = vpop.permute.xlu1 %1031  ;;  %v1030_v8 = vpop.permute.xlu0 %1029 }
 0x1fa   : > { %1042 = vst.msk [vmem:[#allocation3 + $0x30] sm:$0xff] %vm1039_vm4, %v1032_v5  ;;  %1041 = vst.msk [vmem:[#allocation3 + $0x28] sm:$0xff] %vm1039_vm4, %v1030_v8 }
 0x1fd   : > { %v1034_v7 = vpop.permute.xlu1 %1033  ;;  %v1056_v14 = vpop.permute.xlu0 (!%p2795_p7), %1055 }
 0x1fe   : > { %1043 = vst.msk [vmem:[#allocation3 + $0x38] sm:$0xff] %vm1039_vm4, %v1034_v7  ;;  %1067 = vst.msk [vmem:[#allocation3] sm:$0xff] (!%p2795_p7), %vm1039_vm4, %v1056_v14 }
 0x201   : > { %v1060_v13 = vpop.permute.xlu1 %1059  ;;  %v1058_v16 = vpop.permute.xlu0 %1057 }
 0x202   : > { %1069 = vst.msk [vmem:[#allocation3 + $0x10] sm:$0xff] %vm1039_vm4, %v1060_v13  ;;  %1068 = vst.msk [vmem:[#allocation3 + $0x8] sm:$0xff] %vm1039_vm4, %v1058_v16 }
 0x205   : > { %v1062_v15 = vpop.permute.xlu1 %1061  ;;  %v1080_v18 = vpop.permute.xlu0 %1079 }
 0x206   : > { %1070 = vst.msk [vmem:[#allocation3 + $0x18] sm:$0xff] %vm1039_vm4, %v1062_v15  ;;  %1091 = vst.msk [vmem:[#allocation3 + $0x40] sm:$0xff] %vm1039_vm4, %v1080_v18 }
 0x209   : > { %v1082_v17 = vpop.permute.xlu1 %1081  ;;  %v1084_v20 = vpop.permute.xlu0 %1083 }
 0x20a   : > { %1092 = vst.msk [vmem:[#allocation3 + $0x48] sm:$0xff] %vm1039_vm4, %v1082_v17  ;;  %1093 = vst.msk [vmem:[#allocation3 + $0x50] sm:$0xff] %vm1039_vm4, %v1084_v20 }
 0x20d   : > { %v1086_v19 = vpop.permute.xlu1 %1085 }
 0x20e   : > { %1094 = vst.msk [vmem:[#allocation3 + $0x58] sm:$0xff] %vm1039_vm4, %v1086_v19 }
 0x20f PF: > { %p2797_p8 = scmp.ne.s32.totalorder %s3635_s24, 1 }
 0x210   : > { %v1101_v21 = vld [vmem:[#allocation2 + $0x10] sm:$0xff] (!%p2797_p8)  ;;  %v1099_v22 = vld [vmem:[#allocation2] sm:$0xff] (!%p2797_p8)  ;;  %s3659_s19 = smov (!%p2797_p8), 126   ;;  %v1102_v23 = vld [vmem:[#allocation2 + $0x18] sm:$0xff] (!%p2797_p8)  ;;  %s3660_s21 = smov (!%p2797_p8), 122  }
 0x211   : > { %1098 = sbr.rel (%p2797_p8) target bundleno = 657 (0x291), region = 60  ;;  %1111 = vrot.lane.b32.xlu1 (!%p2797_p8), %v1101_v21, %s3659_s19  ;;  %1107 = vrot.lane.b32.xlu0 (!%p2797_p8), %v1099_v22, %s3659_s19  ;;  %v1100_v24 = vld [vmem:[#allocation2 + $0x8] sm:$0xff] (!%p2797_p8) }
 0x215   : > { %1113 = vrot.lane.b32.xlu1 (!%p2797_p8), %v1102_v23, %s3659_s19  ;;  %1109 = vrot.lane.b32.xlu0 (!%p2797_p8), %v1100_v24, %s3659_s19 }
 0x219   : > { %1133 = vrot.lane.b32.xlu1 %v1100_v24, %s3660_s21  ;;  %1131 = vrot.lane.b32.xlu0 %v1099_v22, %s3660_s21 }
 0x21d   : > { %1137 = vrot.lane.b32.xlu1 %v1102_v23, %s3660_s21  ;;  %1135 = vrot.lane.b32.xlu0 %v1101_v21, %s3660_s21 }
 0x283   : > { %v1112_v25 = vpop.permute.xlu1 %1111  ;;  %v1108_v26 = vpop.permute.xlu0 %1107 }
 0x284   : > { %1121 = vst.msk [vmem:[#allocation3 + $0x10] sm:$0xff] %vm1039_vm4, %v1112_v25  ;;  %1119 = vst.msk [vmem:[#allocation3] sm:$0xff] %vm1039_vm4, %v1108_v26 }
 0x287   : > { %v1114_v27 = vpop.permute.xlu1 %1113  ;;  %v1110_v28 = vpop.permute.xlu0 %1109 }
 0x288   : > { %1122 = vst.msk [vmem:[#allocation3 + $0x18] sm:$0xff] %vm1039_vm4, %v1114_v27  ;;  %1120 = vst.msk [vmem:[#allocation3 + $0x8] sm:$0xff] %vm1039_vm4, %v1110_v28 }
 0x28b   : > { %v1134_v29 = vpop.permute.xlu1 %1133  ;;  %v1132_v30 = vpop.permute.xlu0 %1131 }
 0x28c   : > { %1144 = vst.msk [vmem:[#allocation3 + $0x48] sm:$0xff] %vm1039_vm4, %v1134_v29  ;;  %1143 = vst.msk [vmem:[#allocation3 + $0x40] sm:$0xff] %vm1039_vm4, %v1132_v30 }
 0x28f   : > { %v1138_v31 = vpop.permute.xlu1 %1137  ;;  %v1136_v32 = vpop.permute.xlu0 %1135 }
 0x290   : > { %1146 = vst.msk [vmem:[#allocation3 + $0x58] sm:$0xff] %vm1039_vm4, %v1138_v31  ;;  %1145 = vst.msk [vmem:[#allocation3 + $0x50] sm:$0xff] %vm1039_vm4, %v1136_v32 }
 0x291 PF: > { %p2798_p9 = scmp.ne.s32.totalorder %s3635_s24, 2 }
 0x292   : > { %v1161_v33 = vld [vmem:[#allocation2 + $0x10] sm:$0xff] (!%p2798_p9)  ;;  %v1159_v34 = vld [vmem:[#allocation2] sm:$0xff] (!%p2798_p9)  ;;  %v1162_v35 = vld [vmem:[#allocation2 + $0x18] sm:$0xff] (!%p2798_p9)  ;;  %s3661_s22 = smov (!%p2798_p9), 120  }
 0x293   : > { %1150 = sbr.rel (%p2798_p9) target bundleno = 779 (0x30b), region = 64  ;;  %1171 = vrot.lane.b32.xlu1 (!%p2798_p9), %v1161_v33, %s3661_s22  ;;  %1167 = vrot.lane.b32.xlu0 (!%p2798_p9), %v1159_v34, %s3661_s22  ;;  %v1160_v36 = vld [vmem:[#allocation2 + $0x8] sm:$0xff] (!%p2798_p9)  ;;  %1155 = vst.msk [vmem:[#allocation3] sm:$0xff] (!%p2798_p9), %vm1039_vm4, %v1159_v34  ;;  %1157 = vst.msk [vmem:[#allocation3 + $0x10] sm:$0xff] (!%p2798_p9), %vm1039_vm4, %v1161_v33 }
 0x294   : > { %1158 = vst.msk [vmem:[#allocation3 + $0x18] sm:$0xff] (!%p2798_p9), %vm1039_vm4, %v1162_v35  ;;  %1156 = vst.msk [vmem:[#allocation3 + $0x8] sm:$0xff] (!%p2798_p9), %vm1039_vm4, %v1160_v36 }
 0x297   : > { %1173 = vrot.lane.b32.xlu1 (!%p2798_p9), %v1162_v35, %s3661_s22  ;;  %1169 = vrot.lane.b32.xlu0 (!%p2798_p9), %v1160_v36, %s3661_s22 }
 0x305   : > { %v1172_v37 = vpop.permute.xlu1 %1171  ;;  %v1168_v38 = vpop.permute.xlu0 %1167 }
 0x306   : > { %1181 = vst.msk [vmem:[#allocation3 + $0x50] sm:$0xff] %vm1039_vm4, %v1172_v37  ;;  %1179 = vst.msk [vmem:[#allocation3 + $0x40] sm:$0xff] %vm1039_vm4, %v1168_v38 }
 0x309   : > { %v1174_v39 = vpop.permute.xlu1 %1173  ;;  %v1170_v40 = vpop.permute.xlu0 %1169 }
 0x30a   : > { %1182 = vst.msk [vmem:[#allocation3 + $0x58] sm:$0xff] %vm1039_vm4, %v1174_v39  ;;  %1180 = vst.msk [vmem:[#allocation3 + $0x48] sm:$0xff] %vm1039_vm4, %v1170_v40 }
 0x30b PF: > { %v1187_v41 = vld [vmem:[#allocation3] sm:$0xff]  ;;  %v1189_v43 = vld [vmem:[#allocation3 + $0x10] sm:$0xff]  ;;  %v1192_v49 = vld [vmem:[#allocation3 + $0x28] sm:$0xff]  ;;  %v3662_v50 = vmov 0   ;;  %vm1223_vm5 = vcmask 785408   ;;  %vm1986_vm6 = vcmask 261120  }
 0x30c   : > { %v1188_v42 = vld [vmem:[#allocation3 + $0x8] sm:$0xff]  ;;  %v1237_v44 = vand.u32 4294901760, %v1187_v41  ;;  %v1190_v46 = vld [vmem:[#allocation3 + $0x18] sm:$0xff]  ;;  %v1243_v47 = vand.u32 4294901760, %v1189_v43  ;;  %v1191_v48 = vld [vmem:[#allocation3 + $0x20] sm:$0xff]  ;;  %3611 = vset.pattern.permute.xlu0 %v3662_v50  ;;  %3612 = vset.pattern.permute.xlu1 %v3662_v50  ;;  %v1252_v53 = vand.u32 4294901760, %v1192_v49 }
 0x30d   : > { %v1240_v45 = vand.u32 4294901760, %v1188_v42  ;;  %v1246_v51 = vand.u32 4294901760, %v1190_v46  ;;  %v1249_v52 = vand.u32 4294901760, %v1191_v48  ;;  %v1193_v54 = vld [vmem:[#allocation3 + $0x30] sm:$0xff]  ;;  %v1194_v55 = vld [vmem:[#allocation3 + $0x38] sm:$0xff]  ;;  %v1195_v7 = vld [vmem:[#allocation3 + $0x40] sm:$0xff] }
 0x30e   : > { %v3858_v57 = vsub.f32 %v1187_v41, %v1237_v44  ;;  %v3862_v59 = vsub.f32 %v1189_v43, %v1243_v47  ;;  %v3872_v0 = vsub.f32 %v1192_v49, %v1252_v53  ;;  %v1255_v5 = vand.u32 4294901760, %v1193_v54  ;;  %v1199_v9 = vld [vmem:[%s3750_s20] sm:$0xff]  ;;  %v1184_v12 = vld [vmem:[%s3745_s17 + $0x8] sm:$0xff]  ;;  %v1201_v13 = vld [vmem:[%s3750_s20 + $0x10] sm:$0xff] }
 0x30f   : > { %v3856_v56 = vpack.c.bf16 %v1240_v45, %v1237_v44  ;;  %v3860_v58 = vsub.f32 %v1188_v42, %v1240_v45  ;;  %v3864_v60 = vpack.c.bf16 %v1246_v51, %v1243_v47  ;;  %v3866_v61 = vsub.f32 %v1190_v46, %v1246_v51  ;;  %v1183_v11 = vld [vmem:[%s3745_s17] sm:$0xff]  ;;  %1205 = vperm.xlu0 %3611, %v1199_v9   ;;  %v1200_v15 = vld [vmem:[%s3750_s20 + $0x8] sm:$0xff]  ;;  %v1197_v21 = vld [vmem:[#allocation3 + $0x50] sm:$0xff] }
 0x310   : > { %v3868_v62 = vsub.f32 %v1191_v48, %v1249_v52  ;;  %v1258_v6 = vand.u32 4294901760, %v1194_v55  ;;  %v3882_v14 = vpack.c.bf16 %v1252_v53, %v1249_v52  ;;  %v1261_v17 = vand.u32 4294901760, %v1195_v7  ;;  %1215 = vperm.xlu1 %3612, %v1201_v13   ;;  %v1185_v26 = vld [vmem:[%s3745_s17 + $0x10] sm:$0xff]  ;;  %v1202_v27 = vld [vmem:[%s3750_s20 + $0x18] sm:$0xff]  ;;  %v1962_v36 = vld [vmem:[%s3760_s9] sm:$0xff]  ;;  %s3664_s20 = smov (!%p2798_p9), 124  }
 0x311   : > { %v3341_v63 = vpack.c.bf16 %v3860_v58, %v3858_v57  ;;  %v1196_v8 = vld [vmem:[#allocation3 + $0x48] sm:$0xff]  ;;  %3294 = vmatprep.subr.bf16.mxu1 %v3856_v56  ;;  %v3345_v10 = vpack.c.bf16 %v3866_v61, %v3862_v59  ;;  %v3888_v19 = vsub.f32 %v1193_v54, %v1255_v5  ;;  %v1225_v22 = vsel %vm1223_vm5, %v1183_v11, 0  ;;  %v1198_v24 = vld [vmem:[#allocation3 + $0x58] sm:$0xff]  ;;  %v1964_v53 = vld [vmem:[%s3760_s9 + $0x10] sm:$0xff] }
 0x312   : > { %3296 = vmatpush3.bf16.msra.mxu1 %v3856_v56  ;;  %v3349_v16 = vpack.c.bf16 %v3872_v0, %v3868_v62  ;;  %v1264_v18 = vand.u32 4294901760, %v1196_v8  ;;  %v3890_v20 = vsub.f32 %v1194_v55, %v1258_v6  ;;  %v1228_v23 = vsel %vm1223_vm5, %v1184_v12, 0  ;;  %v1186_v30 = vld [vmem:[%s3745_s17 + $0x18] sm:$0xff]  ;;  %v1963_v45 = vld [vmem:[%s3760_s9 + $0x8] sm:$0xff]  ;;  %s3663_s17 = smov 4  }
 0x313   : > { %3342 = vmatprep.subr.bf16.mxu0 %v3341_v63  ;;  %3298 = vmatprep.subr.bf16.mxu1 %v3864_v60  ;;  %v3894_v25 = vand.u32 4294901760, %v1225_v22  ;;  %v3899_v28 = vpack.c.bf16 %v1258_v6, %v1255_v5  ;;  %v3901_v29 = vand.u32 4294901760, %v1228_v23  ;;  %v1356_v31 = vand.u32 4294901760, %v3858_v57 }
 0x314   : > { %3344 = vmatpush3.bf16.msra.mxu0 %v3341_v63  ;;  %1210 = vperm.xlu0 %3611, %v1200_v15   ;;  %v3906_v32 = vsub.f32 %v1195_v7, %v1261_v17  ;;  %v3908_v33 = vsub.f32 %v1196_v8, %v1264_v18  ;;  %v1267_v34 = vand.u32 4294901760, %v1197_v21  ;;  %v3353_v37 = vpack.c.bf16 %v3890_v20, %v3888_v19 }
 0x315   : > { %3346 = vmatprep.subr.bf16.mxu0 %v3345_v10  ;;  %v3911_v35 = vsub.f32 %v1225_v22, %v3894_v25  ;;  %v1270_v38 = vand.u32 4294901760, %v1198_v24  ;;  %v1231_v39 = vsel %vm1223_vm5, %v1185_v26, 0  ;;  %v1363_v40 = vand.u32 4294901760, %v3860_v58  ;;  %1220 = vperm.xlu1 %3612, %v1202_v27  }
 0x316   : > { %3300 = vmatpush3.bf16.msra.mxu1 %v3864_v60  ;;  %v3918_v41 = vpack.c.bf16 %v1264_v18, %v1261_v17  ;;  %v3922_v42 = vsub.f32 %v1228_v23, %v3901_v29  ;;  %v1234_v43 = vsel %vm1223_vm5, %v1186_v30, 0  ;;  %v1357_v46 = vsub.f32 %v3858_v57, %v1356_v31 }
 0x317   : > { %3302 = vmatprep.subr.bf16.mxu1 %v3882_v14  ;;  %3113 = vmatprep.mubr.f32.mxu0 %v3911_v35  ;;  %v1315_v44 = vand.u32 4294901760, %v3911_v35  ;;  %v1364_v47 = vsub.f32 %v3860_v58, %v1363_v40  ;;  %v1370_v48 = vand.u32 4294901760, %v3862_v59  ;;  %v1377_v49 = vand.u32 4294901760, %v3866_v61 }
 0x318   : > { %3348 = vmatpush3.bf16.msra.mxu0 %v3345_v10  ;;  %1968 = vperm.xlu0 %3611, %v1962_v36   ;;  %v3937_v50 = vsub.f32 %v1197_v21, %v1267_v34  ;;  %v3939_v51 = vand.u32 4294901760, %v1231_v39  ;;  %v3357_v54 = vpack.c.bf16 %v3908_v33, %v3906_v32  ;;  %v3947_v55 = vsub.f32 %v1198_v24, %v1270_v38  ;;  %v1965_v10 = vld [vmem:[%s3760_s9 + $0x18] sm:$0xff] }
 0x319   : > { %3350 = vmatprep.subr.bf16.mxu0 %v3349_v16  ;;  %v1316_v52 = vsub.f32 %v3911_v35, %v1315_v44  ;;  %v1325_v63 = vand.u32 4294901760, %v3922_v42  ;;  %v1384_v5 = vand.u32 4294901760, %v3868_v62  ;;  %1973 = vperm.xlu1 %3612, %v1963_v45   ;;  %v3951_v6 = vpack.c.bf16 %v1270_v38, %v1267_v34 }
 0x31a   : > { %3304 = vmatpush3.bf16.msra.mxu1 %v3882_v14  ;;  %v3954_v7 = vand.u32 4294901760, %v1234_v43  ;;  %v1391_v9 = vand.u32 4294901760, %v3872_v0  ;;  %v1358_v11 = vand.u32 4294901760, %v1357_v46  ;;  %v1365_v12 = vand.u32 4294901760, %v1364_v47 }
 0x31b   : > { %3306 = vmatprep.subr.bf16.mxu1 %v3899_v28  ;;  %v1317_v8 = vand.u32 4294901760, %v1316_v52  ;;  %v1371_v13 = vsub.f32 %v3862_v59, %v1370_v48  ;;  %v1378_v15 = vsub.f32 %v3866_v61, %v1377_v49  ;;  %v3361_v17 = vpack.c.bf16 %v3947_v55, %v3937_v50 }
 0x31c   : > { %3352 = vmatpush3.bf16.msra.mxu0 %v3349_v16  ;;  %1978 = vperm.xlu0 %3611, %v1964_v53   ;;  %v3966_v16 = vsub.f32 %v1231_v39, %v3939_v51  ;;  %v1326_v18 = vsub.f32 %v3922_v42, %v1325_v63  ;;  %v1385_v21 = vsub.f32 %v3868_v62, %v1384_v5  ;;  %v1398_v22 = vand.u32 4294901760, %v3888_v19 }
 0x31d   : > { %3354 = vmatprep.subr.bf16.mxu0 %v3353_v37  ;;  %3053 = vmatprep.mubr.f32.mxu1 %v1317_v8  ;;  %v3979_v23 = vsub.f32 %v1234_v43, %v3954_v7  ;;  %v1392_v24 = vsub.f32 %v3872_v0, %v1391_v9  ;;  %v3317_v27 = vpack.c.bf16 %v1365_v12, %v1358_v11  ;;  %v1372_v30 = vand.u32 4294901760, %v1371_v13 }
 0x31e   : > { %3308 = vmatpush3.bf16.msra.mxu1 %v3899_v28  ;;  %1983 = vperm.xlu1 %3612, %v1965_v10   ;;  %v1335_v26 = vand.u32 4294901760, %v3966_v16  ;;  %v1379_v34 = vand.u32 4294901760, %v1378_v15  ;;  %v1405_v36 = vand.u32 4294901760, %v3890_v20  ;;  %v1327_v39 = vand.u32 4294901760, %v1326_v18 }
 0x31f   : > { %3310 = vmatprep.subr.bf16.mxu1 %v3918_v41  ;;  %v1345_v38 = vand.u32 4294901760, %v3979_v23  ;;  %v1386_v43 = vand.u32 4294901760, %v1385_v21  ;;  %v1399_v45 = vsub.f32 %v3888_v19, %v1398_v22  ;;  %v1393_v46 = vand.u32 4294901760, %v1392_v24 }
 0x320   : > { %3356 = vmatpush3.bf16.msra.mxu0 %v3353_v37  ;;  %v1336_v37 = vsub.f32 %v3966_v16, %v1335_v26  ;;  %v1412_v47 = vand.u32 4294901760, %v3906_v32  ;;  %v1406_v8 = vsub.f32 %v3890_v20, %v1405_v36  ;;  %v1419_v10 = vand.u32 4294901760, %v3908_v33 }
 0x321   : > { %3358 = vmatprep.subr.bf16.mxu0 %v3357_v54  ;;  %v1346_v53 = vsub.f32 %v3979_v23, %v1345_v38  ;;  %v3325_v12 = vpack.c.bf16 %v1393_v46, %v1386_v43  ;;  %v1400_v13 = vand.u32 4294901760, %v1399_v45  ;;  %v1426_v21 = vand.u32 4294901760, %v3937_v50 }
 0x322   : > { %3312 = vmatpush3.bf16.msra.mxu1 %v3918_v41  ;;  %v1337_v52 = vand.u32 4294901760, %v1336_v37  ;;  %v1413_v15 = vsub.f32 %v3906_v32, %v1412_v47  ;;  %v1407_v18 = vand.u32 4294901760, %v1406_v8  ;;  %v1433_v24 = vand.u32 4294901760, %v3947_v55 }
 0x323   : > { %3314 = vmatprep.subr.bf16.mxu1 %v3951_v6  ;;  %v1347_v11 = vand.u32 4294901760, %v1346_v53  ;;  %v1427_v37 = vsub.f32 %v3937_v50, %v1426_v21  ;;  %v3389_v35 = vpack.c.bf16 %v1363_v40, %v1356_v31  ;;  %v3397_v57 = vpack.c.bf16 %v1391_v9, %v1384_v5  ;;  %v1960_v40 = vld [vmem:[%s3755_s23 + $0x10] sm:$0xff] }
 0x324   : > { %3360 = vmatpush3.bf16.msra.mxu0 %v3357_v54  ;;  %v3321_v54 = vpack.c.bf16 %v1379_v34, %v1372_v30  ;;  %v3329_v30 = vpack.c.bf16 %v1407_v18, %v1400_v13  ;;  %v3401_v58 = vpack.c.bf16 %v1405_v36, %v1398_v22  ;;  %v3405_v59 = vpack.c.bf16 %v1419_v10, %v1412_v47 }
 0x325   : > { %3362 = vmatprep.subr.bf16.mxu0 %v3361_v17  ;;  %v1428_v45 = vand.u32 4294901760, %v1427_v37  ;;  %v3409_v61 = vpack.c.bf16 %v1433_v24, %v1426_v21  ;;  %vm2633_vm7 = vcmask 162848  }
 0x326   : > { %3316 = vmatpush3.bf16.msra.mxu1 %v3951_v6 }
 0x327   : > { %3318 = vmatprep.subr.bf16.mxu1 %v3317_v27 }
 0x328   : > { %3364 = vmatpush3.bf16.msra.mxu0 %v3361_v17  ;;  %v1420_v17 = vsub.f32 %v3908_v33, %v1419_v10  ;;  %v1959_v33 = vld [vmem:[%s3755_s23 + $0x8] sm:$0xff] }
 0x329   : > { %3366 = vmatprep.subr.bf16.mxu0 %v3856_v56  ;;  %3054 = vmatmul.mubr.f32.vlgmr.msra.gmra.mrb[0].mxu1 %v1327_v39  ;;  %v1434_v39 = vsub.f32 %v3947_v55, %v1433_v24 }
 0x32a   : > { %3320 = vmatpush3.bf16.msra.mxu1 %v3317_v27  ;;  %3056 = vmatprep.mubr.f32.mxu1 %v1337_v52  ;;  %v1414_v27 = vand.u32 4294901760, %v1413_v15  ;;  %v1421_v34 = vand.u32 4294901760, %v1420_v17 }
 0x32b   : > { %3114 = vmatmul.mubr.f32.vlgmr.msra.gmra.mrb[0].mxu0 %v3922_v42  ;;  %3322 = vmatprep.subr.bf16.mxu1 %v3321_v54  ;;  %v1435_v46 = vand.u32 4294901760, %v1434_v39 }
 0x32c   : > { %3368 = vmatpush3.bf16.msra.mxu0 %v3856_v56  ;;  %3116 = vmatprep.mubr.f32.mxu0 %v3966_v16  ;;  %v3333_v43 = vpack.c.bf16 %v1421_v34, %v1414_v27 }
 0x32d   : > { %3370 = vmatprep.subr.bf16.mxu0 %v3864_v60  ;;  %3057 = vmatmul.mubr.f32.gmra.mrb[2].mxu1 %v1347_v11  ;;  %v3337_v50 = vpack.c.bf16 %v1435_v46, %v1428_v45 }
 0x32e   : > { %3324 = vmatpush3.bf16.msra.mxu1 %v3321_v54  ;;  %3083 = vmatprep.mubr.f32.mxu1 %v3894_v25 }
 0x32f   : > { %3117 = vmatmul.mubr.f32.gmra.mrb[2].mxu0 %v3979_v23  ;;  %3326 = vmatprep.subr.bf16.mxu1 %v3325_v12 }
 0x330   : > { %3372 = vmatpush3.bf16.msra.mxu0 %v3864_v60  ;;  %3143 = vmatprep.mubr.f32.mxu0 %v1315_v44  ;;  %v3393_v44 = vpack.c.bf16 %v1377_v49, %v1370_v48  ;;  %v1994_v49 = vsel %vm1986_vm6, %v1960_v40, 0 }
 0x331   : > { %3374 = vmatprep.subr.bf16.mxu0 %v3882_v14  ;;  %v4098_v5 = vand.u32 4294901760, %v1994_v49 }
 0x332   : > { %3328 = vmatpush3.bf16.msra.mxu1 %v3325_v12 }
 0x333   : > { %3330 = vmatprep.subr.bf16.mxu1 %v3329_v30  ;;  %v4107_v53 = vsub.f32 %v1994_v49, %v4098_v5 }
 0x334   : > { %3376 = vmatpush3.bf16.msra.mxu0 %v3882_v14 }
 0x335   : > { %3378 = vmatprep.subr.bf16.mxu0 %v3899_v28 }
 0x336   : > { %3332 = vmatpush3.bf16.msra.mxu1 %v3329_v30  ;;  %v2090_v30 = vand.u32 4294901760, %v4107_v53 }
 0x337   : > { %3334 = vmatprep.subr.bf16.mxu1 %v3333_v43 }
 0x338   : > { %3380 = vmatpush3.bf16.msra.mxu0 %v3899_v28 }
 0x339   : > { %3382 = vmatprep.subr.bf16.mxu0 %v3918_v41 }
 0x33a   : > { %3336 = vmatpush3.bf16.msra.mxu1 %v3333_v43 }
 0x33b   : > { %3338 = vmatprep.subr.bf16.mxu1 %v3337_v50 }
 0x33c   : > { %3384 = vmatpush3.bf16.msra.mxu0 %v3918_v41 }
 0x33d   : > { %3386 = vmatprep.subr.bf16.mxu0 %v3951_v6 }
 0x33e   : > { %3340 = vmatpush3.bf16.msra.mxu1 %v3337_v50 }
 0x340   : > { %3388 = vmatpush3.bf16.msra.mxu0 %v3951_v6 }
 0x341   : > { %3390 = vmatprep.subr.bf16.mxu0 %v3389_v35  ;;  %3084 = vmatmul.mubr.f32.vlgmr.msra.gmra.mrb[0].mxu1 %v3901_v29 }
 0x342   : > { %3086 = vmatprep.mubr.f32.mxu1 %v3939_v51 }
 0x343   : > { %3144 = vmatmul.mubr.f32.vlgmr.msra.gmra.mrb[0].mxu0 %v1325_v63 }
 0x344   : > { %3392 = vmatpush3.bf16.msra.mxu0 %v3389_v35  ;;  %3146 = vmatprep.mubr.f32.mxu0 %v1335_v26 }
 0x345   : > { %3394 = vmatprep.subr.bf16.mxu0 %v3393_v44  ;;  %3087 = vmatmul.mubr.f32.gmra.mrb[2].mxu1 %v3954_v7 }
 0x347   : > { %3147 = vmatmul.mubr.f32.gmra.mrb[2].mxu0 %v1345_v38 }
 0x348   : > { %3396 = vmatpush3.bf16.msra.mxu0 %v3393_v44  ;;  %3173 = vmatprep.mubr.f32.mxu0 %v3894_v25 }
 0x349   : > { %3398 = vmatprep.subr.bf16.mxu0 %v3397_v57 }
 0x34c   : > { %3400 = vmatpush3.bf16.msra.mxu0 %v3397_v57 }
 0x34d   : > { %3402 = vmatprep.subr.bf16.mxu0 %v3401_v58 }
 0x350   : > { %3404 = vmatpush3.bf16.msra.mxu0 %v3401_v58 }
 0x351   : > { %3406 = vmatprep.subr.bf16.mxu0 %v3405_v59 }
 0x354   : > { %3408 = vmatpush3.bf16.msra.mxu0 %v3405_v59 }
 0x355   : > { %3410 = vmatprep.subr.bf16.mxu0 %v3409_v61 }
 0x358   : > { %3412 = vmatpush3.bf16.msra.mxu0 %v3409_v61  ;;  %v2091_v61 = vsub.f32 %v4107_v53, %v2090_v30 }
 0x359   : > { %3414 = vmatprep.subr.bf16.mxu0 %v3856_v56 }
 0x35b   : > { %3174 = vmatmul.mubr.f32.vlgmr.msra.gmra.mrb[0].mxu0 %v3901_v29 }
 0x35c   : > { %3416 = vmatpush3.bf16.msra.mxu0 %v3856_v56  ;;  %3176 = vmatprep.mubr.f32.mxu0 %v3939_v51  ;;  %v1958_v56 = vld [vmem:[%s3755_s23] sm:$0xff] }
 0x35d   : > { %3418 = vmatprep.subr.bf16.mxu0 %v3864_v60 }
 0x35f   : > { %3177 = vmatmul.mubr.f32.gmra.mrb[2].mxu0 %v3954_v7 }
 0x360   : > { %3420 = vmatpush3.bf16.msra.mxu0 %v3864_v60  ;;  %3203 = vmatprep.mubr.f32.mxu0 %v3894_v25  ;;  %v1988_v60 = vsel %vm1986_vm6, %v1958_v56, 0 }
 0x361   : > { %3422 = vmatprep.subr.bf16.mxu0 %v3882_v14  ;;  %v4082_v62 = vand.u32 4294901760, %v1988_v60 }
 0x363   : > { %v4085_v0 = vsub.f32 %v1988_v60, %v4082_v62 }
 0x364   : > { %3424 = vmatpush3.bf16.msra.mxu0 %v3882_v14 }
 0x365   : > { %3426 = vmatprep.subr.bf16.mxu0 %v3899_v28  ;;  %v2070_v14 = vand.u32 4294901760, %v4085_v0 }
 0x367   : > { %v2071_v19 = vsub.f32 %v4085_v0, %v2070_v14 }
 0x368   : > { %3428 = vmatpush3.bf16.msra.mxu0 %v3899_v28 }
 0x369   : > { %3430 = vmatprep.subr.bf16.mxu0 %v3918_v41  ;;  %v2072_v20 = vand.u32 4294901760, %v2071_v19 }
 0x36b   : > { %3217 = vmatprep.mubr.f32.mxu1 %v2072_v20 }
 0x36c   : > { %3432 = vmatpush3.bf16.msra.mxu0 %v3918_v41  ;;  %v1991_v41 = vsel %vm1986_vm6, %v1959_v33, 0 }
 0x36d   : > { %3434 = vmatprep.subr.bf16.mxu0 %v3951_v6  ;;  %v4096_v55 = vand.u32 4294901760, %v1991_v41 }
 0x36f   : > { %v4102_v23 = vsub.f32 %v1991_v41, %v4096_v55  ;;  %v2092_v41 = vand.u32 4294901760, %v2091_v61 }
 0x370   : > { %3436 = vmatpush3.bf16.msra.mxu0 %v3951_v6 }
 0x371   : > { %v2080_v15 = vand.u32 4294901760, %v4102_v23 }
 0x373   : > { %3204 = vmatmul.mubr.f32.vlgmr.msra.gmra.mrb[0].mxu0 %v3901_v29  ;;  %v2081_v46 = vsub.f32 %v4102_v23, %v2080_v15 }
 0x374   : > { %3206 = vmatprep.mubr.f32.mxu0 %v3939_v51  ;;  %v1961_v51 = vld [vmem:[%s3755_s23 + $0x18] sm:$0xff] }
 0x375   : > { %v1997_v6 = vsel %vm1986_vm6, %v1961_v51, 0 }
 0x376   : > { %v4104_v38 = vand.u32 4294901760, %v1997_v6 }
 0x377   : > { %3207 = vmatmul.mubr.f32.gmra.mrb[2].mxu0 %v3954_v7 }
 0x378   : > { %v4111_v21 = vsub.f32 %v1997_v6, %v4104_v38 }
 0x37a   : > { %v2100_v44 = vand.u32 4294901760, %v4111_v21 }
 0x37c   : > { %v2101_v33 = vsub.f32 %v4111_v21, %v2100_v44 }
 0x37e   : > { %v2102_v6 = vand.u32 4294901760, %v2101_v33 }
 0x38e   : > { %v1206_v32 = vpop.permute.xlu0 %1205 }
 0x38f   : > { %v1216_v48 = vpop.permute.xlu1 %1215 }
 0x393   : > { %v1211_v42 = vpop.permute.xlu0 %1210 }
 0x394   : > { %v1221_v26 = vpop.permute.xlu1 %1220 }
 0x414   : > { %v3085_v25 = vpop.f32.mrb[0].mxu1 }
 0x415   : > { %v1480_v28 = vpop.f32.mrb[1].mxu1  ;;  %v3509_v63 = vadd.f32 %v3085_v25, %v1211_v42 }
 0x416   : > { %v3511_v7 = vadd.f32 %v1480_v28, %v1206_v32  ;;  %v2082_v28 = vand.u32 4294901760, %v2081_v46 }
 0x418   : > { %v3088_v29 = vpop.f32.mrb[2].mxu1 }
 0x419   : > { %v1492_v31 = vpop.f32.mrb[3].mxu1  ;;  %v3513_v47 = vadd.f32 %v3088_v29, %v1221_v26 }
 0x41a   : > { %v3515_v54 = vadd.f32 %v1492_v31, %v1216_v48 }
 0x446   : > { %v3205_v9 = vpop.f32.mrb[0].mxu0 }
 0x447   : > { %v3510_v16 = vadd.f32 %v3509_v63, %v3205_v9  ;;  %v1932_v22 = vpop.f32.mrb[1].mxu0 }
 0x448   : > { %v3512_v36 = vadd.f32 %v3511_v7, %v1932_v22 }
 0x449   : > { %v1955_v52 = vmax.f32 %v3510_v16, 0.0 }
 0x44a   : > { %v1954_v8 = vmax.f32 %v3512_v36, 0.0  ;;  %v3208_v10 = vpop.f32.mrb[2].mxu0 }
 0x44b   : > { %v2003_v11 = vand.u32 4294901760, %v1955_v52  ;;  %v3514_v12 = vadd.f32 %v3513_v47, %v3208_v10  ;;  %v1944_v13 = vpop.f32.mrb[3].mxu0 }
 0x44c   : > { %v2000_v18 = vand.u32 4294901760, %v1954_v8  ;;  %v3516_v17 = vadd.f32 %v3515_v54, %v1944_v13 }
 0x44d   : > { %v2117_v24 = vsub.f32 %v1955_v52, %v2003_v11  ;;  %v1957_v27 = vmax.f32 %v3514_v12, 0.0 }
 0x44e   : > { %v4114_v34 = vpack.c.bf16 %v2003_v11, %v2000_v18  ;;  %v2110_v37 = vsub.f32 %v1954_v8, %v2000_v18  ;;  %v1956_v39 = vmax.f32 %v3516_v17, 0.0 }
 0x44f   : > { %v2118_v43 = vand.u32 4294901760, %v2117_v24  ;;  %v2009_v45 = vand.u32 4294901760, %v1957_v27 }
 0x450   : > { %v2111_v50 = vand.u32 4294901760, %v2110_v37  ;;  %v2006_v35 = vand.u32 4294901760, %v1956_v39  ;;  %3438 = vmatprep.subr.bf16.mxu1 %v4114_v34  ;;  %v3453_v57 = vpack.c.bf16 %v2117_v24, %v2110_v37 }
 0x451   : > { %v2131_v58 = vsub.f32 %v1957_v27, %v2009_v45  ;;  %3440 = vmatpush3.bf16.msra.mxu1 %v4114_v34  ;;  %v2119_v59 = vsub.f32 %v2117_v24, %v2118_v43 }
 0x452   : > { %v3441_v56 = vpack.c.bf16 %v2009_v45, %v2006_v35  ;;  %v2124_v60 = vsub.f32 %v1956_v39, %v2006_v35  ;;  %v2112_v19 = vsub.f32 %v2110_v37, %v2111_v50  ;;  %v3469_v20 = vpack.c.bf16 %v2118_v43, %v2111_v50 }
 0x453   : > { %v2132_v25 = vand.u32 4294901760, %v2131_v58  ;;  %v2120_v29 = vand.u32 4294901760, %v2119_v59 }
 0x454   : > { %v2125_v31 = vand.u32 4294901760, %v2124_v60  ;;  %3442 = vmatprep.subr.bf16.mxu1 %v3441_v56  ;;  %v2113_v32 = vand.u32 4294901760, %v2112_v19  ;;  %v3457_v40 = vpack.c.bf16 %v2131_v58, %v2124_v60 }
 0x455   : > { %3444 = vmatpush3.bf16.msra.mxu1 %v3441_v56  ;;  %v2133_v42 = vsub.f32 %v2131_v58, %v2132_v25 }
 0x456   : > { %v3445_v48 = vpack.c.bf16 %v2120_v29, %v2113_v32  ;;  %v2126_v49 = vsub.f32 %v2124_v60, %v2125_v31  ;;  %v3473_v51 = vpack.c.bf16 %v2132_v25, %v2125_v31 }
 0x457   : > { %v2134_v63 = vand.u32 4294901760, %v2133_v42 }
 0x458   : > { %3218 = vmatmul.mubr.f32.vlgmr.msra.gmra.mrb[4].mxu1 %v2082_v28  ;;  %3446 = vmatprep.subr.bf16.mxu1 %v3445_v48  ;;  %v2127_v7 = vand.u32 4294901760, %v2126_v49 }
 0x459   : > { %3448 = vmatpush3.bf16.msra.mxu1 %v3445_v48  ;;  %3220 = vmatprep.mubr.f32.mxu1 %v2092_v41 }
 0x45a   : > { %v3449_v9 = vpack.c.bf16 %v2134_v63, %v2127_v7 }
 0x45c   : > { %3221 = vmatmul.mubr.f32.gmra.mrb[6].mxu1 %v2102_v6  ;;  %3450 = vmatprep.subr.bf16.mxu1 %v3449_v9 }
 0x45d   : > { %3452 = vmatpush3.bf16.msra.mxu1 %v3449_v9  ;;  %3231 = vmatprep.mubr.f32.mxu1 %v4082_v62 }
 0x45e   : > { %3454 = vmatprep.subr.bf16.mxu1 %v3453_v57 }
 0x460   : > { %3232 = vmatmul.mubr.f32.vlgmr.msra.gmra.mrb[4].mxu1 %v4096_v55 }
 0x461   : > { %3456 = vmatpush3.bf16.msra.mxu1 %v3453_v57  ;;  %3234 = vmatprep.mubr.f32.mxu1 %v4098_v5 }
 0x462   : > { %3458 = vmatprep.subr.bf16.mxu1 %v3457_v40 }
 0x464   : > { %3235 = vmatmul.mubr.f32.gmra.mrb[6].mxu1 %v4104_v38 }
 0x465   : > { %3460 = vmatpush3.bf16.msra.mxu1 %v3457_v40  ;;  %3245 = vmatprep.mubr.f32.mxu1 %v4085_v0  ;;  %v1974_v0 = vpop.permute.xlu1 %1973 }
 0x466   : > { %3462 = vmatprep.subr.bf16.mxu1 %v4114_v34 }
 0x468   : > { %3246 = vmatmul.mubr.f32.vlgmr.msra.gmra.mrb[4].mxu1 %v4102_v23 }
 0x469   : > { %3464 = vmatpush3.bf16.msra.mxu1 %v4114_v34  ;;  %3248 = vmatprep.mubr.f32.mxu1 %v4107_v53  ;;  %v1984_v36 = vpop.permute.xlu1 %1983 }
 0x46a   : > { %3466 = vmatprep.subr.bf16.mxu1 %v3441_v56 }
 0x46c   : > { %3249 = vmatmul.mubr.f32.gmra.mrb[6].mxu1 %v4111_v21 }
 0x46d   : > { %3468 = vmatpush3.bf16.msra.mxu1 %v3441_v56  ;;  %3259 = vmatprep.mubr.f32.mxu1 %v2070_v14  ;;  %v1969_v14 = vpop.permute.xlu0 %1968 }
 0x46e   : > { %3470 = vmatprep.subr.bf16.mxu1 %v3469_v20 }
 0x470   : > { %3260 = vmatmul.mubr.f32.vlgmr.msra.gmra.mrb[4].mxu1 %v2080_v15 }
 0x471   : > { %3472 = vmatpush3.bf16.msra.mxu1 %v3469_v20  ;;  %3262 = vmatprep.mubr.f32.mxu1 %v2090_v30  ;;  %v1979_v52 = vpop.permute.xlu0 %1978 }
 0x472   : > { %3474 = vmatprep.subr.bf16.mxu1 %v3473_v51 }
 0x474   : > { %3263 = vmatmul.mubr.f32.gmra.mrb[6].mxu1 %v2100_v44 }
 0x475   : > { %3476 = vmatpush3.bf16.msra.mxu1 %v3473_v51  ;;  %3273 = vmatprep.mubr.f32.mxu1 %v4082_v62 }
 0x476   : > { %3478 = vmatprep.subr.bf16.mxu1 %v4114_v34 }
 0x478   : > { %3274 = vmatmul.mubr.f32.vlgmr.msra.gmra.mrb[4].mxu1 %v4096_v55 }
 0x479   : > { %3480 = vmatpush3.bf16.msra.mxu1 %v4114_v34  ;;  %3276 = vmatprep.mubr.f32.mxu1 %v4098_v5 }
 0x47a   : > { %3482 = vmatprep.subr.bf16.mxu1 %v3441_v56 }
 0x47c   : > { %3277 = vmatmul.mubr.f32.gmra.mrb[6].mxu1 %v4104_v38 }
 0x47d   : > { %3484 = vmatpush3.bf16.msra.mxu1 %v3441_v56  ;;  %3287 = vmatprep.mubr.f32.mxu1 %v4082_v62 }
 0x480   : > { %3288 = vmatmul.mubr.f32.vlgmr.msra.gmra.mrb[4].mxu1 %v4096_v55 }
 0x481   : > { %3290 = vmatprep.mubr.f32.mxu1 %v4098_v5 }
 0x484   : > { %3291 = vmatmul.mubr.f32.gmra.mrb[6].mxu1 %v4104_v38 }
 0x553   : > { %v3289_v16 = vpop.f32.mrb[4].mxu1 }
 0x554   : > { %v3517_v22 = vadd.f32 %v3289_v16, %v1974_v0  ;;  %v2591_v23 = vpop.f32.mrb[5].mxu1 }
 0x555   : > { %v3518_v26 = vadd.f32 %v2591_v23, %v1969_v14 }
 0x556   : > { %2619 = vrot.lane.b32.xlu1 %v3517_v22, %s3663_s17 }
 0x557   : > { %v3292_v47 = vpop.f32.mrb[6].mxu1  ;;  %2617 = vrot.lane.b32.xlu0 %v3518_v26, %s3663_s17 }
 0x558   : > { %v3519_v53 = vadd.f32 %v3292_v47, %v1984_v36  ;;  %v2603_v62 = vpop.f32.mrb[7].mxu1 }
 0x559   : > { %v3520_v54 = vadd.f32 %v2603_v62, %v1979_v52 }
 0x55a   : > { %2623 = vrot.lane.b32.xlu1 %v3519_v53, %s3663_s17 }
 0x55b   : > { %2621 = vrot.lane.b32.xlu0 %v3520_v54, %s3663_s17 }
 0x5c8   : > { %v2620_v55 = vpop.permute.xlu1 %2619 }
 0x5c9   : > { %v2630_v5 = vadd.f32 %v2620_v55, %v3818_v4  ;;  %v2618_v38 = vpop.permute.xlu0 %2617 }
 0x5ca   : > { %v2629_v8 = vadd.f32 %v2618_v38, %v3812_v2  ;;  %2640 = sbr.rel (%p2798_p9) target bundleno = 1616 (0x650), region = 68 }
 0x5cb   : > { %2635 = vst.msk [vmem:[#allocation2 + $0x8] sm:$0xff] %vm2633_vm7, %v2630_v5 }
 0x5cc   : > { %2634 = vst.msk [vmem:[#allocation2] sm:$0xff] %vm2633_vm7, %v2629_v8  ;;  %v2624_v10 = vpop.permute.xlu1 %2623 }
 0x5cd   : > { %v2632_v11 = vadd.f32 %v2624_v10, %v3816_v3  ;;  %v2622_v12 = vpop.permute.xlu0 %2621 }
 0x5ce   : > { %v2631_v13 = vadd.f32 %v2622_v12, %v3810_v1 }
 0x5cf   : > { %2637 = vst.msk [vmem:[#allocation2 + $0x18] sm:$0xff] %vm2633_vm7, %v2632_v11 }
 0x5d0   : > { %2636 = vst.msk [vmem:[#allocation2 + $0x10] sm:$0xff] %vm2633_vm7, %v2631_v13 }
 0x5d2   : > { %v2642_v18 = vld [vmem:[#allocation2 + $0x8] sm:$0xff] }
 0x5d3   : > { %v2641_v4 = vld [vmem:[#allocation2] sm:$0xff] }
 0x5d4   : > { %2649 = vrot.lane.b32.xlu0 %v2641_v4, %s3664_s20 }
 0x5d6   : > { %v2644_v2 = vld [vmem:[#allocation2 + $0x18] sm:$0xff] }
 0x5d7   : > { %v2643_v15 = vld [vmem:[#allocation2 + $0x10] sm:$0xff] }
 0x5d8   : > { %2653 = vrot.lane.b32.xlu1 %v2643_v15, %s3664_s20  ;;  %2651 = vrot.lane.b32.xlu0 %v2642_v18, %s3664_s20 }
 0x5dc   : > { %2655 = vrot.lane.b32.xlu1 %v2644_v2, %s3664_s20 }
 0x646   : > { %v2650_v1 = vpop.permute.xlu0 %2649 }
 0x647   : > { %2661 = vst.msk [vmem:[%s3765_s12] sm:$0xff] %vm1039_vm4, %v2650_v1 }
 0x64a   : > { %v2654_v3 = vpop.permute.xlu1 %2653  ;;  %v2652_v21 = vpop.permute.xlu0 %2651 }
 0x64b   : > { %2663 = vst.msk [vmem:[%s3765_s12 + $0x10] sm:$0xff] %vm1039_vm4, %v2654_v3  ;;  %2662 = vst.msk [vmem:[%s3765_s12 + $0x8] sm:$0xff] %vm1039_vm4, %v2652_v21 }
 0x64e   : > { %v2656_v17 = vpop.permute.xlu1 %2655 }
 0x64f   : > { %2664 = vst.msk [vmem:[%s3765_s12 + $0x18] sm:$0xff] %vm1039_vm4, %v2656_v17 }
 0x650 PF: > { %s17_s28 = sadd.s32 1, %s3651_s28   ;;  %s4190_s23 = sld [smem:[#allocation4_spill]] }
 0x651   : > { %p14_p10 = scmp.ge.s32.totalorder %s17_s28, 8   ;;  %s4191_s24 = smov %s3643_s26 }
 0x652   : > { %s4192_s25 = smov %s3647_s27  ;;  %s4193_s26 = smov %s4196_s29 }
 0x653   :  { %16 = sbr.rel (!%p14_p10) target bundleno = 3 (0x3), region = 110 }
 0x656   : > { %s4194_s27 = smov %s4190_s23 }

</bundles_post_ra>
